<compile_context>
chip_gen: v7x
topology: tpu7x:2x2x1
jax: 0.10.0
libtpu: 0.0.40
codegen_flags: <defaults>
</compile_context>

<pallas_src>
import functools

import jax
import jax.numpy as jnp
from jax import lax
from jax.experimental import pallas as pl
from jax.experimental.pallas import tpu as pltpu


def _round_up(x, m):
    return (x + m - 1) // m * m


def _mha_map_kernel(q_ref, kp_ref, bias_ref, wq_ref, bq_ref, out_ref, *,
                    num_heads, head_dim, hw_pad):
    # q_ref:    (1, TQ, D)        queries for this (batch, q-tile), compute dtype
    # kp_ref:   (1, hidden, HWp)  precomputed k projection (per batch), compute dtype
    # bias_ref: (1, 1, HWp)       additive mask bias (0.0 or finfo.min), fp32
    # wq_ref:   (hidden, D)       q weights (torch layout), pre-scaled by norm
    # bq_ref:   (hidden, 1)       q bias, pre-scaled by norm, fp32
    # out_ref:  (1, TQ, N*HWp)    softmax attention map (head-major, HW padded)
    q = q_ref[0]                                        # (TQ, D)
    kp = kp_ref[0]                                      # (hidden, HWp)
    bias = bias_ref[0]                                  # (1, HWp), fp32
    cd = q.dtype                                        # MXU operand dtype

    # q projection, transposed result: qpT[h, t] = sum_d wq[h, d] * q[t, d].
    # fp32 accumulation on the MXU; normalize_fact already folded into wq/bq.
    qpT = lax.dot_general(wq_ref[...], q, (((1,), (1,)), ((), ())),
                          preferred_element_type=jnp.float32) + bq_ref[...]

    tq = out_ref.shape[1]
    m = jnp.full((tq, 1), -jnp.inf, dtype=jnp.float32)  # online row max

    # Per-head QK^T written head-major straight into the lane-aligned output
    # block.  Both per-head operands are sublane slices (offsets multiple of
    # head_dim); no lane relayouts, no concatenate, no extra logits scratch.
    for n in range(num_heads):
        lo = n * head_dim
        qh = qpT[lo:lo + head_dim, :].astype(cd)        # (hd, TQ)
        kh = kp[lo:lo + head_dim, :]                    # (hd, HWp)
        ln = lax.dot_general(qh, kh, (((0,), (0,)), ((), ())),
                             preferred_element_type=jnp.float32)   # (TQ, HWp)
        ln = ln + bias                                  # additive mask bias
        out_ref[0, :, n * hw_pad:(n + 1) * hw_pad] = ln
        m = jnp.maximum(m, jnp.max(ln, axis=-1, keepdims=True))

    # Joint softmax over (num_heads * HW); logits are already masked, row max
    # already known, so this is a single exp + sum pass over the block.
    logits = out_ref[0]                                 # (TQ, N*HWp), fp32
    e = jnp.exp(logits - m)
    s = jnp.sum(e, axis=-1, keepdims=True)
    out_ref[0] = (e * pl.reciprocal(s, approx=False)).astype(out_ref.dtype)


def _pick_q_tile(Q, row_bytes, q_tile):
    """Largest TQ (multiple of 8, <=128) whose double-buffered fp32 output
    block stays under ~12 MiB (v7x-VMEM-friendly)."""
    if q_tile is not None:
        return max(8, min(_round_up(q_tile, 8), _round_up(Q, 8)))
    tq = min(128, _round_up(Q, 8))
    while tq > 8 and 2 * tq * row_bytes > (12 << 20):
        tq = max(8, _round_up(tq // 2, 8))
    return tq


def dab_detr_mh_attention_map(q, k_nchw, mask, wq, bq, wk, bk, num_heads,
                              *, q_tile=None, compute_dtype=jnp.bfloat16):
    """q: (B, Q, D); k_nchw: (B, D, H, W); mask: (B, H, W) bool or None.
    wq, wk: (hidden, D) (torch Linear convention); bq, bk: (hidden,).
    compute_dtype: MXU operand dtype (default bf16; use jnp.float32 for strict
    reference matching).  Accumulation and softmax math are always fp32.
    Returns (B, Q, num_heads, H, W) fp32 attention maps.
    Note: a row that is FULLY masked softmaxes uniformly over the padded
    N*HWp columns (reference: N*HW) -- not an issue for normal DETR masks."""
    f32 = jnp.float32
    B, Q, D = q.shape
    _, C, H, W = k_nchw.shape
    assert C == D
    hidden = wq.shape[0]
    assert hidden % num_heads == 0
    head_dim = hidden // num_heads
    HW = H * W
    HWp = _round_up(HW, 128)                     # lane-aligned spatial width
    normalize_fact = float(hidden / num_heads) ** (-0.5)

    cd = jnp.dtype(compute_dtype)
    cdb = cd.itemsize

    # ---- Q tiling -----------------------------------------------------------
    row_bytes = num_heads * HWp * 4              # fp32 output row per query
    TQ = _pick_q_tile(Q, row_bytes, q_tile)
    Qp = _round_up(Q, TQ)
    n_q_tiles = Qp // TQ

    # ---- Wrapper precompute (plain XLA, layout glue) ------------------------
    # k projection HOISTED out of the grid: (B, D, HW) is a pure reshape of
    # NCHW (no HBM transpose); bf16/f32 operands with fp32 accumulation, then
    # padded to HWp (padded columns are killed by the additive mask bias).
    k_flat = k_nchw.reshape(B, D, HW).astype(cd)
    wk_cd = jnp.asarray(wk, f32).astype(cd)
    kp = jnp.einsum('oc,bcl->bol', wk_cd, k_flat,
                    preferred_element_type=f32,
                    precision=lax.Precision.HIGHEST)
    kp = kp + jnp.asarray(bk, f32)[None, :, None]
    kp_p = jnp.zeros((B, hidden, HWp), cd).at[:, :, :HW].set(kp.astype(cd))

    # Queries: pad Q to Qp (extra rows are sliced off afterwards).
    q_p = jnp.zeros((B, Qp, D), cd).at[:, :Q, :].set(q.astype(cd))

    # Additive mask bias (0.0 keep / finfo.min drop); padded columns masked.
    neg = float(jnp.finfo(f32).min)
    if mask is None:
        row = jnp.zeros((B, HW), f32)
    else:
        row = jnp.where(mask.reshape(B, HW), neg, 0.0).astype(f32)
    bias = jnp.full((B, 1, HWp), neg, f32).at[:, 0, :HW].set(row)

    # Fold normalize_fact into the q projection (exact).
    wq_eff = (jnp.asarray(wq, f32) * normalize_fact).astype(cd)     # (hidden, D)
    bq_eff = (jnp.asarray(bq, f32) * normalize_fact).reshape(hidden, 1)

    # ---- Resource sizing / cost hint ----------------------------------------
    blk_bytes = (TQ * D * cdb                    # q block
                 + hidden * HWp * cdb            # kp block
                 + HWp * 4                       # bias block
                 + TQ * num_heads * HWp * 4)     # out block
    const_bytes = hidden * D * cdb + hidden * 4
    vmem_limit = int(min(max(2 * (blk_bytes + const_bytes) + (8 << 20),
                             32 << 20), 100 << 20))

    flops = 2 * B * Qp * hidden * (D + HWp)
    transcendentals = B * Qp * num_heads * HWp
    bytes_accessed = int(q_p.size * cdb + kp_p.size * cdb * n_q_tiles
                         + bias.size * 4 + wq_eff.size * cdb + hidden * 4
                         + 2 * B * Qp * num_heads * HWp * 4)
    cost = pl.CostEstimate(flops=flops, transcendentals=transcendentals,
                           bytes_accessed=bytes_accessed)

    kernel = functools.partial(_mha_map_kernel, num_heads=num_heads,
                               head_dim=head_dim, hw_pad=HWp)

    out_flat = pl.pallas_call(
        kernel,
        out_shape=jax.ShapeDtypeStruct((B, Qp, num_heads * HWp), jnp.float32),
        grid_spec=pltpu.PrefetchScalarGridSpec(
            num_scalar_prefetch=0,
            grid=(B, n_q_tiles),
            in_specs=[
                pl.BlockSpec((1, TQ, D), lambda b, qi: (b, qi, 0)),
                pl.BlockSpec((1, hidden, HWp), lambda b, qi: (b, 0, 0)),
                pl.BlockSpec((1, 1, HWp), lambda b, qi: (b, 0, 0)),
                pl.BlockSpec((hidden, D), lambda b, qi: (0, 0)),
                pl.BlockSpec((hidden, 1), lambda b, qi: (0, 0)),
            ],
            out_specs=pl.BlockSpec((1, TQ, num_heads * HWp),
                                   lambda b, qi: (b, qi, 0)),
        ),
        compiler_params=pltpu.CompilerParams(
            dimension_semantics=("parallel", "parallel"),
            vmem_limit_bytes=vmem_limit),
        cost_estimate=cost,
    )(q_p, kp_p, bias, wq_eff, bq_eff)

    out = out_flat.reshape(B, Qp, num_heads, HWp)[:, :Q, :, :HW]
    return out.reshape(B, Q, num_heads, H, W)


def _reference(q, k_nchw, mask, wq, bq, wk, bk, num_heads):
    """Pure-JAX reference mirroring the PyTorch code literally (fp32)."""
    B, Q, D = q.shape
    hidden = wq.shape[0]
    head_dim = hidden // num_heads
    norm = float(hidden / num_heads) ** (-0.5)
    hi = lax.Precision.HIGHEST
    qp = jnp.einsum('bqd,hd->bqh', q, wq, precision=hi) + bq
    kp = jnp.einsum('oc,bchw->bohw', wk, k_nchw, precision=hi) \
        + bk[None, :, None, None]
    qh = qp.reshape(B, Q, num_heads, head_dim)
    kh = kp.reshape(B, num_heads, head_dim, *k_nchw.shape[-2:])
    w = jnp.einsum('bqnc,bnchw->bqnhw', qh * norm, kh, precision=hi)
    if mask is not None:
        w = jnp.where(mask[:, None, None, :, :], jnp.finfo(w.dtype).min, w)
    shp = w.shape
    w = jax.nn.softmax(w.reshape(B, Q, -1), axis=-1).reshape(shp)
    return w


if __name__ == "__main__":
    B, Q, D = 2, 8, 32          # batch, num queries, query_dim (== feature C)
    hidden, num_heads = 32, 4
    H = W = 8

    key = jax.random.PRNGKey(0)
    kq, kk, kwq, kbq, kwk, kbk = jax.random.split(key, 6)
    q = jax.random.normal(kq, (B, Q, D), jnp.float32)
    k_nchw = jax.random.normal(kk, (B, D, H, W), jnp.float32)
    wq = jax.random.normal(kwq, (hidden, D), jnp.float32) * 0.1
    bq = jax.random.normal(kbq, (hidden,), jnp.float32) * 0.1
    wk = jax.random.normal(kwk, (hidden, D), jnp.float32) * 0.1
    bk = jax.random.normal(kbk, (hidden,), jnp.float32) * 0.1

    # Deterministic padding mask: mask out the last 2 columns of batch 1.
    mask = jnp.zeros((B, H, W), bool).at[1, :, -2:].set(True)

    ref = _reference(q, k_nchw, mask, wq, bq, wk, bk, num_heads)

    # fp32 path: strict match against the reference.
    out32 = dab_detr_mh_attention_map(q, k_nchw, mask, wq, bq, wk, bk,
                                      num_heads, compute_dtype=jnp.float32)
    out32 = jax.block_until_ready(out32)
    assert out32.shape == (B, Q, num_heads, H, W)
    assert jnp.allclose(out32, ref, atol=1e-5, rtol=1e-5)

    # Default bf16-operand path (fp32 accumulation / softmax): loose tolerance.
    out16 = dab_detr_mh_attention_map(q, k_nchw, mask, wq, bq, wk, bk,
                                      num_heads)
    out16 = jax.block_until_ready(out16)
    assert out16.shape == (B, Q, num_heads, H, W)
    assert jnp.allclose(out16, ref, atol=5e-3, rtol=5e-2)

    print("KERNEL_OK")
</pallas_src>

<mosaic_0001>
module attributes {stable_mosaic.version = 11 : i64} {
  func.func @_mha_map_kernel(%arg0: i32, %arg1: i32, %arg2: memref<1x8x32xf32, #tpu.memory_space<vmem>>, %arg3: memref<1x32x128xf32, #tpu.memory_space<vmem>>, %arg4: memref<1x1x128xf32, #tpu.memory_space<vmem>>, %arg5: memref<32x32xf32, #tpu.memory_space<vmem>>, %arg6: memref<32x1xf32, #tpu.memory_space<vmem>>, %arg7: memref<1x8x512xf32, #tpu.memory_space<vmem>>) attributes {dimension_semantics = [#tpu.dimension_semantics<parallel>, #tpu.dimension_semantics<parallel>], iteration_bounds = array<i64: 2, 1>, scalar_prefetch = 0 : i64, scratch_operands = 0 : i64, tpu.core_type = #tpu.core_type<tc>, window_params = [{transform_indices = @transform_0, window_bounds = array<i64: 1, 8, 32>}, {transform_indices = @transform_1, window_bounds = array<i64: 1, 32, 128>}, {transform_indices = @transform_2, window_bounds = array<i64: 1, 1, 128>}, {pipeline_mode = #tpu.pipeline_mode<synchronous>, transform_indices = @transform_3, window_bounds = array<i64: 32, 32>}, {pipeline_mode = #tpu.pipeline_mode<synchronous>, transform_indices = @transform_4, window_bounds = array<i64: 32, 1>}, {transform_indices = @transform_5, window_bounds = array<i64: 1, 8, 512>}]} {
    %c0 = arith.constant 0 : index
    %c0_0 = arith.constant 0 : index
    %c0_1 = arith.constant 0 : index
    %0 = vector.load %arg2[%c0, %c0_0, %c0_1] : memref<1x8x32xf32, #tpu.memory_space<vmem>>, vector<1x8x32xf32>
    %1 = vector.shape_cast %0 : vector<1x8x32xf32> to vector<8x32xf32>
    %c0_2 = arith.constant 0 : index
    %c0_3 = arith.constant 0 : index
    %c0_4 = arith.constant 0 : index
    %2 = vector.load %arg3[%c0_2, %c0_3, %c0_4] : memref<1x32x128xf32, #tpu.memory_space<vmem>>, vector<1x32x128xf32>
    %3 = vector.shape_cast %2 : vector<1x32x128xf32> to vector<32x128xf32>
    %c0_5 = arith.constant 0 : index
    %c0_6 = arith.constant 0 : index
    %c0_7 = arith.constant 0 : index
    %4 = vector.load %arg4[%c0_5, %c0_6, %c0_7] : memref<1x1x128xf32, #tpu.memory_space<vmem>>, vector<1x1x128xf32>
    %5 = vector.shape_cast %4 : vector<1x1x128xf32> to vector<1x128xf32>
    %c0_8 = arith.constant 0 : index
    %c0_9 = arith.constant 0 : index
    %6 = vector.load %arg5[%c0_8, %c0_9] : memref<32x32xf32, #tpu.memory_space<vmem>>, vector<32x32xf32>
    %cst = arith.constant dense<0.000000e+00> : vector<32x8xf32>
    %7 = tpu.matmul %6, %1, %cst {dimension_numbers = #tpu.dot_dimension_numbers<[1], [1], [0], [0], [0, 0, 1, 0], [], []>} : vector<32x32xf32>, vector<8x32xf32>, vector<32x8xf32> -> vector<32x8xf32>
    %c0_10 = arith.constant 0 : index
    %c0_11 = arith.constant 0 : index
    %8 = vector.load %arg6[%c0_10, %c0_11] : memref<32x1xf32, #tpu.memory_space<vmem>>, vector<32x1xf32>
    %9 = vector.broadcast %8 : vector<32x1xf32> to vector<32x8xf32>
    %10 = arith.addf %7, %9 : vector<32x8xf32>
    %cst_12 = arith.constant 0xFF800000 : f32
    %11 = vector.broadcast %cst_12 : f32 to vector<8x1xf32>
    %12 = vector.extract_strided_slice %10 {offsets = [0, 0], sizes = [8, 8], strides = [1, 1]} : vector<32x8xf32> to vector<8x8xf32>
    %13 = vector.extract_strided_slice %3 {offsets = [0, 0], sizes = [8, 128], strides = [1, 1]} : vector<32x128xf32> to vector<8x128xf32>
    %cst_13 = arith.constant dense<0.000000e+00> : vector<8x128xf32>
    %14 = tpu.matmul %12, %13, %cst_13 {dimension_numbers = #tpu.dot_dimension_numbers<[0], [0], [1], [1], [0, 1, 1, 1], [], []>} : vector<8x8xf32>, vector<8x128xf32>, vector<8x128xf32> -> vector<8x128xf32>
    %15 = vector.broadcast %5 : vector<1x128xf32> to vector<8x128xf32>
    %16 = arith.addf %14, %15 : vector<8x128xf32>
    %c0_14 = arith.constant 0 : index
    %c0_15 = arith.constant 0 : index
    %c0_16 = arith.constant 0 : index
    %17 = vector.load %arg7[%c0_14, %c0_15, %c0_16] : memref<1x8x512xf32, #tpu.memory_space<vmem>>, vector<1x8x128xf32>
    %18 = vector.shape_cast %17 : vector<1x8x128xf32> to vector<8x128xf32>
    %19 = vector.shape_cast %16 : vector<8x128xf32> to vector<1x8x128xf32>
    tpu.vector_store %arg7[%c0_14, %c0_15, %c0_16], %19 {strides = array<i32>} : memref<1x8x512xf32, #tpu.memory_space<vmem>>, vector<1x8x128xf32>,
    %cst_17 = arith.constant dense<0xFF800000> : vector<8xf32>
    %20 = vector.multi_reduction <maximumf>, %16, %cst_17 [1] : vector<8x128xf32> to vector<8xf32>
    %21 = vector.shape_cast %20 : vector<8xf32> to vector<8x1xf32>
    %22 = arith.maximumf %11, %21 : vector<8x1xf32>
    %23 = vector.extract_strided_slice %10 {offsets = [8, 0], sizes = [8, 8], strides = [1, 1]} : vector<32x8xf32> to vector<8x8xf32>
    %24 = vector.extract_strided_slice %3 {offsets = [8, 0], sizes = [8, 128], strides = [1, 1]} : vector<32x128xf32> to vector<8x128xf32>
    %cst_18 = arith.constant dense<0.000000e+00> : vector<8x128xf32>
    %25 = tpu.matmul %23, %24, %cst_18 {dimension_numbers = #tpu.dot_dimension_numbers<[0], [0], [1], [1], [0, 1, 1, 1], [], []>} : vector<8x8xf32>, vector<8x128xf32>, vector<8x128xf32> -> vector<8x128xf32>
    %26 = vector.broadcast %5 : vector<1x128xf32> to vector<8x128xf32>
    %27 = arith.addf %25, %26 : vector<8x128xf32>
    %c0_19 = arith.constant 0 : index
    %c0_20 = arith.constant 0 : index
    %c128 = arith.constant 128 : index
    %28 = vector.load %arg7[%c0_19, %c0_20, %c128] : memref<1x8x512xf32, #tpu.memory_space<vmem>>, vector<1x8x128xf32>
    %29 = vector.shape_cast %28 : vector<1x8x128xf32> to vector<8x128xf32>
    %30 = vector.shape_cast %27 : vector<8x128xf32> to vector<1x8x128xf32>
    tpu.vector_store %arg7[%c0_19, %c0_20, %c128], %30 {strides = array<i32>} : memref<1x8x512xf32, #tpu.memory_space<vmem>>, vector<1x8x128xf32>,
    %cst_21 = arith.constant dense<0xFF800000> : vector<8xf32>
    %31 = vector.multi_reduction <maximumf>, %27, %cst_21 [1] : vector<8x128xf32> to vector<8xf32>
    %32 = vector.shape_cast %31 : vector<8xf32> to vector<8x1xf32>
    %33 = arith.maximumf %22, %32 : vector<8x1xf32>
    %34 = vector.extract_strided_slice %10 {offsets = [16, 0], sizes = [8, 8], strides = [1, 1]} : vector<32x8xf32> to vector<8x8xf32>
    %35 = vector.extract_strided_slice %3 {offsets = [16, 0], sizes = [8, 128], strides = [1, 1]} : vector<32x128xf32> to vector<8x128xf32>
    %cst_22 = arith.constant dense<0.000000e+00> : vector<8x128xf32>
    %36 = tpu.matmul %34, %35, %cst_22 {dimension_numbers = #tpu.dot_dimension_numbers<[0], [0], [1], [1], [0, 1, 1, 1], [], []>} : vector<8x8xf32>, vector<8x128xf32>, vector<8x128xf32> -> vector<8x128xf32>
    %37 = vector.broadcast %5 : vector<1x128xf32> to vector<8x128xf32>
    %38 = arith.addf %36, %37 : vector<8x128xf32>
    %c0_23 = arith.constant 0 : index
    %c0_24 = arith.constant 0 : index
    %c256 = arith.constant 256 : index
    %39 = vector.load %arg7[%c0_23, %c0_24, %c256] : memref<1x8x512xf32, #tpu.memory_space<vmem>>, vector<1x8x128xf32>
    %40 = vector.shape_cast %39 : vector<1x8x128xf32> to vector<8x128xf32>
    %41 = vector.shape_cast %38 : vector<8x128xf32> to vector<1x8x128xf32>
    tpu.vector_store %arg7[%c0_23, %c0_24, %c256], %41 {strides = array<i32>} : memref<1x8x512xf32, #tpu.memory_space<vmem>>, vector<1x8x128xf32>,
    %cst_25 = arith.constant dense<0xFF800000> : vector<8xf32>
    %42 = vector.multi_reduction <maximumf>, %38, %cst_25 [1] : vector<8x128xf32> to vector<8xf32>
    %43 = vector.shape_cast %42 : vector<8xf32> to vector<8x1xf32>
    %44 = arith.maximumf %33, %43 : vector<8x1xf32>
    %45 = vector.extract_strided_slice %10 {offsets = [24, 0], sizes = [8, 8], strides = [1, 1]} : vector<32x8xf32> to vector<8x8xf32>
    %46 = vector.extract_strided_slice %3 {offsets = [24, 0], sizes = [8, 128], strides = [1, 1]} : vector<32x128xf32> to vector<8x128xf32>
    %cst_26 = arith.constant dense<0.000000e+00> : vector<8x128xf32>
    %47 = tpu.matmul %45, %46, %cst_26 {dimension_numbers = #tpu.dot_dimension_numbers<[0], [0], [1], [1], [0, 1, 1, 1], [], []>} : vector<8x8xf32>, vector<8x128xf32>, vector<8x128xf32> -> vector<8x128xf32>
    %48 = vector.broadcast %5 : vector<1x128xf32> to vector<8x128xf32>
    %49 = arith.addf %47, %48 : vector<8x128xf32>
    %c0_27 = arith.constant 0 : index
    %c0_28 = arith.constant 0 : index
    %c384 = arith.constant 384 : index
    %50 = vector.load %arg7[%c0_27, %c0_28, %c384] : memref<1x8x512xf32, #tpu.memory_space<vmem>>, vector<1x8x128xf32>
    %51 = vector.shape_cast %50 : vector<1x8x128xf32> to vector<8x128xf32>
    %52 = vector.shape_cast %49 : vector<8x128xf32> to vector<1x8x128xf32>
    tpu.vector_store %arg7[%c0_27, %c0_28, %c384], %52 {strides = array<i32>} : memref<1x8x512xf32, #tpu.memory_space<vmem>>, vector<1x8x128xf32>,
    %cst_29 = arith.constant dense<0xFF800000> : vector<8xf32>
    %53 = vector.multi_reduction <maximumf>, %49, %cst_29 [1] : vector<8x128xf32> to vector<8xf32>
    %54 = vector.shape_cast %53 : vector<8xf32> to vector<8x1xf32>
    %55 = arith.maximumf %44, %54 : vector<8x1xf32>
    %c0_30 = arith.constant 0 : index
    %c0_31 = arith.constant 0 : index
    %c0_32 = arith.constant 0 : index
    %56 = vector.load %arg7[%c0_30, %c0_31, %c0_32] : memref<1x8x512xf32, #tpu.memory_space<vmem>>, vector<1x8x512xf32>
    %57 = vector.shape_cast %56 : vector<1x8x512xf32> to vector<8x512xf32>
    %58 = vector.broadcast %55 : vector<8x1xf32> to vector<8x512xf32>
    %59 = arith.subf %57, %58 : vector<8x512xf32>
    %60 = math.exp %59 : vector<8x512xf32>
    %cst_33 = arith.constant dense<0.000000e+00> : vector<8xf32>
    %61 = vector.multi_reduction <add>, %60, %cst_33 [1] : vector<8x512xf32> to vector<8xf32>
    %62 = vector.shape_cast %61 : vector<8xf32> to vector<8x1xf32>
    %63 = tpu.reciprocal %62 : vector<8x1xf32> -> vector<8x1xf32>
    %64 = vector.broadcast %63 : vector<8x1xf32> to vector<8x512xf32>
    %65 = arith.mulf %60, %64 : vector<8x512xf32>
    %c0_34 = arith.constant 0 : index
    %c0_35 = arith.constant 0 : index
    %c0_36 = arith.constant 0 : index
    %66 = vector.load %arg7[%c0_34, %c0_35, %c0_36] : memref<1x8x512xf32, #tpu.memory_space<vmem>>, vector<1x8x512xf32>
    %67 = vector.shape_cast %66 : vector<1x8x512xf32> to vector<8x512xf32>
    %68 = vector.shape_cast %65 : vector<8x512xf32> to vector<1x8x512xf32>
    tpu.vector_store %arg7[%c0_34, %c0_35, %c0_36], %68 {strides = array<i32>} : memref<1x8x512xf32, #tpu.memory_space<vmem>>, vector<1x8x512xf32>,
    return
  }
  func.func @transform_0(%arg0: i32, %arg1: i32) -> (i32, i32, i32) {
    %c0_i32 = arith.constant 0 : i32
    %c0_i32_0 = arith.constant 0 : i32
    return %arg0, %arg1, %c0_i32 : i32, i32, i32
  }
  func.func @transform_1(%arg0: i32, %arg1: i32) -> (i32, i32, i32) {
    %c0_i32 = arith.constant 0 : i32
    %c0_i32_0 = arith.constant 0 : i32
    %c0_i32_1 = arith.constant 0 : i32
    return %arg0, %c0_i32, %c0_i32_0 : i32, i32, i32
  }
  func.func @transform_2(%arg0: i32, %arg1: i32) -> (i32, i32, i32) {
    %c0_i32 = arith.constant 0 : i32
    %c0_i32_0 = arith.constant 0 : i32
    %c0_i32_1 = arith.constant 0 : i32
    return %arg0, %c0_i32, %c0_i32_0 : i32, i32, i32
  }
  func.func @transform_3(%arg0: i32, %arg1: i32) -> (i32, i32) {
    %c0_i32 = arith.constant 0 : i32
    %c0_i32_0 = arith.constant 0 : i32
    %c0_i32_1 = arith.constant 0 : i32
    return %c0_i32, %c0_i32_0 : i32, i32
  }
  func.func @transform_4(%arg0: i32, %arg1: i32) -> (i32, i32) {
    %c0_i32 = arith.constant 0 : i32
    %c0_i32_0 = arith.constant 0 : i32
    %c0_i32_1 = arith.constant 0 : i32
    return %c0_i32, %c0_i32_0 : i32, i32
  }
  func.func @transform_5(%arg0: i32, %arg1: i32) -> (i32, i32, i32) {
    %c0_i32 = arith.constant 0 : i32
    %c0_i32_0 = arith.constant 0 : i32
    return %arg0, %arg1, %c0_i32 : i32, i32, i32
  }
}

</mosaic_0001>

<bundles_post_ra>
// kernel: tpu_custom_call.1
= control target key start
LH: loop header
LB: loop body
LE: loop exit
PB: predicated region body
PF: predicated region fallthrough
CT: control target
= control target key end

     0   :  { %10 = vsyncpa [#allocation3], 0  ;;  %s1662_s0 = inlined_call_operand.hbm [shape: f32[2,8,32], index: 0, kind: input, shape index: {}]   ;;  %s1663_s1 = inlined_call_operand.hbm [shape: f32[2,32,128], index: 1, kind: input, shape index: {}]   ;;  %s1664_s2 = inlined_call_operand.vmem [shape: f32[2,1,128], index: 2, kind: input, shape index: {}]   ;;  %s1665_s3 = inlined_call_operand.vmem [shape: f32[32,32], index: 3, kind: input, shape index: {}]   ;;  %s1666_s4 = inlined_call_operand.vmem [shape: f32[32,1], index: 4, kind: input, shape index: {}]   ;;  %s1667_s5 = inlined_call_operand.hbm [shape: f32[2,8,512], index: 5, kind: output, shape index: {}]  }
   0x1   :  { %12 = vsyncpa [#allocation3 + $0x1], 0 }
   0x2   :  { %13 = vsyncpa [#allocation6], 0 }
   0x3   :  { %15 = vsyncpa [#allocation6 + $0x1], 0 }
   0x4   :  { %16 = vsyncpa [#allocation4], 0 }
   0x5   :  { %18 = vsyncpa [#allocation4 + $0x1], 0  ;;  %s1390_s18 = smov 0   ;;  %s1392_s19 = smov 0  }
   0x6   :  { %s1394_s20 = smov 0   ;;  %s1396_s21 = smov 0  }
   0x7   :  { %s1398_s22 = smov 0   ;;  %s1400_s23 = smov 0  }
   0x8 LB: > { %s1049_s24 = sadd.s32 4294967295, %s1350_s23   ;;  %s1050_s25 = sadd.s32 4294967294, %s1350_s23   ;;  %s1350_s23 = sphi %s1400_s23, %s24_s23   ;;  %s1346_s22 = sphi %s1398_s22, %s1686_s22   ;;  %s1342_s21 = sphi %s1396_s21, %s1685_s21   ;;  %s1338_s20 = sphi %s1394_s20, %s1684_s20   ;;  %s1334_s19 = sphi %s1392_s19, %s1683_s19   ;;  %s1330_s18 = sphi %s1390_s18, %s1682_s18  }
   0x9   : > { %s36_s26 = sadd.s32 1, %s1346_s22  ;;  %s45_s27 = sadd.s32 1, %s1338_s20 }
   0xa   : > { %p38_p0 = scmp.ge.s32.totalorder %s36_s26, 2  ;;  %p52_p1 = scmp.ne.s32.totalorder %s1338_s20, %s1334_s19 }
   0xb   : > { %p53_p2 = scmp.eq.s32.totalorder %s1350_s23, 0  ;;  %p58_p3 = scmp.ne.s32.totalorder %s1334_s19, %s1330_s18 }
   0xc   : > { %s1688_s26 = smov (%p38_p0, %s36_s26), 0  ;;  %p59_p5 = scmp.eq.s32.totalorder %s1049_s24, 0 }
   0xd   : > { %p1431_p4 = por %p53_p2, %p52_p1  ;;  %s40_s29 = ssub.s32 %s1346_s22, %s1688_s26 }
   0xe   : > { %p178_p6 = scmp.eq.s32.totalorder %s1049_s24, 1  ;;  %p43_p7 = scmp.eq.s32.totalorder %s40_s29, 0 }
   0xf   : > { %p1437_p8 = por %p59_p5, %p58_p3  ;;  %p184_p10 = scmp.eq.s32.totalorder %s1050_s25, 1 }
  0x10   : > { %p1441_p9 = por %p178_p6, %p52_p1  ;;  %p1137_p13 = scmp.lt.s32.totalorder %s1350_s23, 2 }
  0x11   : > { %s1671_s30 = scalar_select %p1437_p8, 1, 0 }
  0x12   : > { %s1672_s6 = scalar_select %p1441_p9, 1, 0 }
  0x13   : > { %s1446_s7 = scalar_select %p43_p7, %s1338_s20, %s45_s27  }
  0x14   : > { %p1448_p11 = por %p184_p10, %p58_p3  ;;  %s1455_s9 = sand.u32 1, %s1338_s20  }
  0x15   : > { %s1053_s10 = sshll.u32 %s1455_s9, 3  ;;  %s1054_s11 = sshll.u32 %s1346_s22, 7 }
  0x16   : > { %s1673_s8 = scalar_select %p1448_p11, 1, 0 }
  0x17   : > { %s1462_s14 = scalar_lea.hbm %s1662_s0, %s1054_s11  ;;  %s214_s15 = scalar_lea.vmem [#allocation2], %s1053_s10 }
  0x18   : > { %s222_s16 = sshll.u32 %s214_s15, 4  ;;  %p1468_p0 = pnand %p1137_p13, %p1431_p4  ;;  %s1464_s16 = int_to_ptr.vmem [resolvable:$true] %s222_s16 }
  0x19   : > { %s211_s24 = scalar_lea.sflag [#allocation3], %s1455_s9  ;;  %s1204_s25 = scalar_lea.hbm %s1462_s14, 128 }
  0x1a   : > { %p1205_p3 = scmp.ne.s32.totalorder %s1462_s14, %s1204_s25  ;;  %p1206_p5 = pneg %p1468_p0 }
  0x1b   : > { %s1209_s28 = scalar_lea.hbm %s1662_s0, 256  ;;  %p1210_p4 = scmp.lt.u32.totalorder %s1462_s14, %s1662_s0 }
  0x1c   : > { %p1207_p6 = pnand %p1206_p5, %p1205_p3  ;;  %p1211_p10 = scmp.lt.u32.totalorder %s1209_s28, %s1204_s25 }
  0x1d   : > { %p1213_p12 = scmp.lt.u32.totalorder %s1204_s25, %s1462_s14 }
  0x1e   : > { %p1208_p7 = pneg %p1207_p6  ;;  %p1212_p13 = por %p1211_p10, %p1210_p4 }
  0x20   : > { %p1214_p1 = por %p1213_p12, %p1212_p13 }
  0x22   : > { %p1215_p2 = pnand %p1214_p1, %p1208_p7 }
  0x24   : > { %1218 = shalt.err (!%p1215_p2)
}
  0x25   : > { %s1219_s12 = scalar_lea.vmem %s1464_s16, 128  ;;  %s1352_s13 = smov [#allocation2]  }
  0x26   : > { %p1220_p3 = scmp.ne.s32.totalorder %s1464_s16, %s1219_s12  ;;  %s1224_s15 = sshll.u32 %s1352_s13, 4  ;;  %s1225_s15 = int_to_ptr.vmem [resolvable:$false] %s1224_s15 }
  0x27   : > { %s1226_s27 = scalar_lea.vmem %s1225_s15, 256  ;;  %p1227_p9 = scmp.lt.s32.totalorder %s1464_s16, %s1225_s15 }
  0x28   : > { %p1222_p6 = pnand %p1220_p3, %p1206_p5  ;;  %p1228_p4 = scmp.lt.s32.totalorder %s1226_s27, %s1219_s12 }
  0x2a   : > { %p1223_p11 = pneg %p1222_p6  ;;  %p1229_p10 = por %p1228_p4, %p1227_p9 }
  0x2c   : > { %p1230_p12 = pnand %p1229_p10, %p1223_p11 }
  0x2e   : > { %1233 = shalt.err (!%p1230_p12)
}
  0x2f   : > { %1129 = dma.hbm_to_vmem [thread:$0]  (!%p1468_p0), %s1462_s14, 128, %s1464_s16, %s211_s24  }
  0x30   : > { %p1675_p1 = scmp.lt.s32.totalorder %s1350_s23, 3  ;;  %p1676_p2 = scmp.ge.s32.totalorder %s1350_s23, 1 }
  0x31   : > { %s1055_s29 = sshll.u32 %s1455_s9, 5  ;;  %s1077_s28 = sshll.u32 %s1346_s22, 9 }
  0x32   : > { %p1504_p7 = pnand %p1676_p2, %p1675_p1  ;;  %s1513_s12 = scalar_lea.hbm %s1663_s1, %s1077_s28 }
  0x33   : > { %s233_s13 = scalar_lea.vmem [#allocation5], %s1055_s29  ;;  %s230_s14 = scalar_lea.sflag [#allocation6], %s1455_s9 }
  0x34   : > { %s240_s15 = sshll.u32 %s233_s13, 4  ;;  %s1234_s16 = scalar_lea.hbm %s1513_s12, 512  ;;  %s1515_s15 = int_to_ptr.vmem [resolvable:$true] %s240_s15 }
  0x35   : > { %p1235_p9 = scmp.ne.s32.totalorder %s1513_s12, %s1234_s16  ;;  %s1239_s28 = scalar_lea.hbm %s1663_s1, 1024 }
  0x36   : > { %p1240_p3 = scmp.lt.u32.totalorder %s1513_s12, %s1663_s1  ;;  %p1241_p6 = scmp.lt.u32.totalorder %s1239_s28, %s1234_s16 }
  0x37   : > { %p1237_p11 = pnand %p1235_p9, %p1206_p5  ;;  %p1243_p10 = scmp.lt.u32.totalorder %s1234_s16, %s1513_s12 }
  0x38   : > { %p1242_p4 = por %p1241_p6, %p1240_p3 }
  0x39   : > { %p1238_p13 = pneg %p1237_p11 }
  0x3a   : > { %p1244_p12 = por %p1243_p10, %p1242_p4 }
  0x3c   : > { %p1245_p1 = pnand %p1244_p12, %p1238_p13 }
  0x3e   : > { %1248 = shalt.err (!%p1245_p1)
}
  0x3f   : > { %s1249_s29 = scalar_lea.vmem %s1515_s15, 512  ;;  %s1353_s13 = smov [#allocation5]  }
  0x40   : > { %p1250_p2 = scmp.ne.s32.totalorder %s1515_s15, %s1249_s29  ;;  %s1254_s24 = sshll.u32 %s1353_s13, 4  ;;  %s1255_s24 = int_to_ptr.vmem [resolvable:$false] %s1254_s24 }
  0x41   : > { %s1256_s27 = scalar_lea.vmem %s1255_s24, 1024  ;;  %p1257_p8 = scmp.lt.s32.totalorder %s1515_s15, %s1255_s24 }
  0x42   : > { %p1252_p9 = pnand %p1250_p2, %p1206_p5  ;;  %p1258_p3 = scmp.lt.s32.totalorder %s1256_s27, %s1249_s29 }
  0x44   : > { %p1253_p11 = pneg %p1252_p9  ;;  %p1259_p6 = por %p1258_p3, %p1257_p8 }
  0x46   : > { %p1260_p4 = pnand %p1259_p6, %p1253_p11 }
  0x48   : > { %1263 = shalt.err (!%p1260_p4)
}
  0x49   : > { %s1354_s16 = smov 128   ;;  %s1355_s28 = smov 8  }
  0x4a   : > { %1132 = dma.hbm_to_vmem [thread:$0]  (!%p1468_p0), %s1513_s12, 512, %s1515_s15, %s230_s14, %s1354_s16, %s1354_s16, %s1355_s28  }
  0x4b   : > { %258 = sbr.rel (%p1504_p7) target bundleno = 996 (0x3e4), region = 40  ;;  %s1546_s10 = sand.u32 (!%p1504_p7), 1, %s1334_s19  }
  0x4c   : > { %s1059_s11 = sshll.u32 (!%p1504_p7), %s1546_s10, 3  ;;  %s261_s29 = scalar_lea.sflag (!%p1504_p7), [#allocation3], %s1546_s10 }
  0x4d   : > { %s264_s13 = scalar_lea.vmem (!%p1504_p7), [#allocation2], %s1059_s11  ;;  %p1678_p8 = scmp.ne.s32.totalorder (!%p1504_p7), %s1671_s30, 0 }
  0x52   : > { %1317 = dma.done.wait (%p1678_p8), %s261_s29, 128  }
  0x53   : > { %1319 = vsyncadd (%p1678_p8), %s261_s29, 4294967168  ;;  %s1060_s9 = sshll.u32 %s1546_s10, 5  ;;  %s270_s17 = scalar_lea.sflag [#allocation6], %s1546_s10 }
  0x54   : > { %s1558_s25 = scalar_lea.vmem [#allocation5], %s1060_s9 }
  0x55   : > { %1321 = dma.done.wait (%p1678_p8), %s270_s17, 512  }
  0x56   : > { %1323 = vsyncadd (%p1678_p8), %s270_s17, 4294966784  ;;  %v1356_v0 = vmov 0   ;;  %vm345_vm0 = vcmask 261120   ;;  %v311_v1 = vld [vmem:[%s264_s13] sm:$0xff]  ;;  %v323_v5 = vld [vmem:[%s1666_s4 + $0x10] sm:$0xff]  ;;  %v1357_v11 = vmov 0.0  }
  0x57   : > { %1192 = vset.pattern.permute.xlu0 %v1356_v0  ;;  %1193 = vset.pattern.permute.xlu1 %v1356_v0  ;;  %v317_v2 = vld [vmem:[%s1665_s3] sm:$0xff]  ;;  %v318_v4 = vld [vmem:[%s1665_s3 + $0x8] sm:$0xff]  ;;  %v319_v6 = vld [vmem:[%s1665_s3 + $0x10] sm:$0xff]  ;;  %vm1358_vm1 = vmmov 0   ;;  %vm484_vm2 = vcmask 64512   ;;  %p308_p0 = scmp.lt.s32.totalorder %s1342_s21, 1 }
  0x58   : > { %1092 = vmatprep.subr.msk.mxu0 %vm345_vm0, %v311_v1  ;;  %1094 = vmatprep.mubr.msk.f32.mxu0 %vm345_vm0, %v317_v2  ;;  %v321_v3 = vld [vmem:[%s1666_s4] sm:$0xff]  ;;  %v322_v7 = vld [vmem:[%s1666_s4 + $0x8] sm:$0xff]  ;;  %v324_v8 = vld [vmem:[%s1666_s4 + $0x18] sm:$0xff]  ;;  %s307_s11 = scalar_lea.vmem [#allocation7], %s1060_s9  ;;  %p1679_p7 = scmp.ne.s32.totalorder %s1672_s6, 0 }
  0x59   : > { %1093 = vmatpush3.xpose.msk.msra.mxu0 %vm345_vm0, %v311_v1  ;;  %327 = vperm.xlu0 %1192, %v321_v3   ;;  %v320_v9 = vld [vmem:[%s1665_s3 + $0x18] sm:$0xff]  ;;  %v312_v10 = vld [vmem:[%s1558_s25] sm:$0xff]  ;;  %v315_v22 = vld [vmem:[%s1558_s25 + $0x18] sm:$0xff]  ;;  %s309_s30 = scalar_select %p308_p0, %s1342_s21, 1 }
  0x5a   : > { %337 = vperm.xlu1 %1193, %v323_v5   ;;  %1100 = vmatprep.subr.mxu1 %v1357_v11  ;;  %v313_v25 = vld [vmem:[%s1558_s25 + $0x8] sm:$0xff]  ;;  %v314_v28 = vld [vmem:[%s1558_s25 + $0x10] sm:$0xff]  ;;  %s1078_s25 = sshll.u32 %s1342_s21, 9  ;;  %s935_s29 = sshll.u32 %s307_s11, 4  ;;  %s1615_s29 = int_to_ptr.vmem [resolvable:$true] %s935_s29 }
  0x5b   : > { %1102 = vmatprep.mubr.msk.f32.mxu1 %vm1358_vm1, %v1357_v11  ;;  %1101 = vmatpush3.msra.mxu1 %v312_v10  ;;  %s310_s28 = scalar_lea.vmem %s1664_s2, %s309_s30  ;;  %s1613_s12 = scalar_lea.hbm %s1667_s5, %s1078_s25 }
  0x5c   : > { %1095 = vmatmul.mubr.msk.f32.vlgmr.msra.gmra.mrb[0].mxu0 %vm345_vm0, %v318_v4  ;;  %1115 = vmatprep.subr.mxu0 %v1357_v11  ;;  %v1067_v31 = vld [vmem:[%s310_s28] ss:$0 sm:$0xff]  ;;  %s919_s21 = scalar_lea.sflag [#allocation4], %s1546_s10  ;;  %s1264_s9 = scalar_lea.vmem %s1615_s29, 512 }
  0x5d   : > { %1097 = vmatprep.mubr.msk.f32.mxu0 %vm345_vm0, %v319_v6  ;;  %332 = vperm.xlu0 %1192, %v322_v7   ;;  %p1265_p5 = scmp.ne.s32.totalorder %s1615_s29, %s1264_s9  ;;  %s1359_s15 = smov [#allocation7]  }
  0x5e   : > { %342 = vperm.xlu1 %1193, %v324_v8   ;;  %1105 = vmatprep.subr.mxu1 %v1357_v11  ;;  %s1268_s14 = sshll.u32 %s1359_s15, 4  ;;  %s1269_s14 = int_to_ptr.vmem [resolvable:$false] %s1268_s14 }
  0x5f   : > { %1116 = vmatpush3.msra.mxu0 %v315_v22  ;;  %p1266_p13 = pnand %p1265_p5, %p1679_p7  ;;  %s1270_s24 = scalar_lea.vmem %s1269_s14, 1024 }
  0x60   : > { %1098 = vmatmul.mubr.msk.f32.gmra.mrb[2].mxu0 %vm345_vm0, %v320_v9  ;;  %p1271_p12 = scmp.lt.s32.totalorder %s1615_s29, %s1269_s14  ;;  %p1272_p1 = scmp.lt.s32.totalorder %s1270_s24, %s1264_s9 }
  0x61   : > { %1117 = vmatprep.mubr.msk.f32.mxu0 %vm1358_vm1, %v1357_v11  ;;  %p1267_p10 = pneg %p1266_p13 }
  0x62   : > { %p1273_p2 = por %p1272_p1, %p1271_p12 }
  0x64   : > { %p1274_p9 = pnand %p1273_p2, %p1267_p10 }
  0xd8   : > { %v328_v12 = vpop.permute.xlu0 %327 }
  0xd9   : > { %v338_v17 = vpop.permute.xlu1 %337 }
  0xdc   : > { %v333_v13 = vpop.permute.xlu0 %332 }
  0xdd   : > { %v343_v23 = vpop.permute.xlu1 %342 }
 0x12f   : > { %v1096_v14 = vpop.f32.mrb[0].mxu0 }
 0x130   : > { %v433_v15 = vadd.f32 %v1096_v14, %v333_v13  ;;  %v427_v16 = vpop.f32.mrb[1].mxu0 }
 0x131   : > { %v428_v18 = vadd.f32 %v427_v16, %v328_v12 }
 0x132   : > { %561 = vxpose.xlu1.b32.start.end [1/1] (short) (narrow) %v433_v15, 8 }
 0x133   : > { %v1099_v19 = vpop.f32.mrb[2].mxu0  ;;  %452 = vxpose.xlu0.b32.start.end [1/1] (short) (narrow) %v428_v18, 8 }
 0x134   : > { %v437_v20 = vpop.f32.mrb[3].mxu0  ;;  %v443_v24 = vadd.f32 %v1099_v19, %v343_v23 }
 0x135   : > { %v438_v21 = vadd.f32 %v437_v20, %v338_v17 }
 0x137   : > { %670 = vxpose.xlu0.b32.start.end [1/1] (short) (narrow) %v438_v21, 8 }
 0x13b   : > { %779 = vxpose.xlu0.b32.start.end [1/1] (short) (narrow) %v443_v24, 8 }
 0x1b2   : > { %v577_v27 = vpop.trf.xlu1 }
 0x1b3   : > { %v468_v26 = vpop.trf.xlu0 }
 0x1b4   : > { %1103 = vmatmul.mubr.msk.f32.vlgmr.msra.gmra.mrb[0].mxu1 %vm484_vm2, %v468_v26 }
 0x1b5   : > { %1106 = vmatpush3.msra.mxu1 %v313_v25  ;;  %1107 = vmatprep.mubr.msk.f32.mxu1 %vm1358_vm1, %v1357_v11 }
 0x1b6   : > { %1110 = vmatprep.subr.mxu1 %v1357_v11 }
 0x1b7   : > { %v686_v29 = vpop.trf.xlu0 }
 0x1b8   : > { %1108 = vmatmul.mubr.msk.f32.vlgmr.msra.gmra.mrb[2].mxu1 %vm484_vm2, %v577_v27 }
 0x1b9   : > { %1111 = vmatpush3.msra.mxu1 %v314_v28  ;;  %1112 = vmatprep.mubr.msk.f32.mxu1 %vm1358_vm1, %v1357_v11 }
 0x1bb   : > { %v795_v30 = vpop.trf.xlu0 }
 0x1bc   : > { %1113 = vmatmul.mubr.msk.f32.vlgmr.msra.gmra.mrb[4].mxu1 %vm484_vm2, %v686_v29  ;;  %1118 = vmatmul.mubr.msk.f32.vlgmr.msra.gmra.mrb[4].mxu0 %vm484_vm2, %v795_v30 }
 0x287   : > { %v554_v32 = vpop.f32.mrb[0].mxu1 }
 0x288   : > { %v555_v33 = vadd.f32 %v1067_v31, %v554_v32  ;;  %v1104_v34 = vpop.f32.mrb[1].mxu1 }
 0x28a   : > { %559 = vmax.xlane.f32.xlu0 %v555_v33 }
 0x28b   : > { %v662_v35 = vpop.f32.mrb[2].mxu1 }
 0x28c   : > { %v663_v36 = vadd.f32 %v1067_v31, %v662_v35  ;;  %v1109_v37 = vpop.f32.mrb[3].mxu1 }
 0x28e   : > { %667 = vmax.xlane.f32.xlu1 %v663_v36 }
 0x28f   : > { %v771_v38 = vpop.f32.mrb[4].mxu1  ;;  %v880_v39 = vpop.f32.mrb[4].mxu0 }
 0x290   : > { %v772_v40 = vadd.f32 %v1067_v31, %v771_v38  ;;  %v1114_v41 = vpop.f32.mrb[5].mxu1  ;;  %v881_v42 = vadd.f32 %v1067_v31, %v880_v39  ;;  %v1119_v43 = vpop.f32.mrb[5].mxu0 }
 0x292   : > { %776 = vmax.xlane.f32.xlu1 %v772_v40  ;;  %885 = vmax.xlane.f32.xlu0 %v881_v42 }
 0x317   : > { %v560_v44 = vpop.xlane.xlu0 %559 }
 0x31b   : > { %v668_v45 = vpop.xlane.xlu1 %667 }
 0x31c   : > { %v669_v46 = vmax.f32 %v560_v44, %v668_v45 }
 0x31f   : > { %v777_v47 = vpop.xlane.xlu1 %776  ;;  %v886_v48 = vpop.xlane.xlu0 %885 }
 0x320   : > { %v778_v49 = vmax.f32 %v669_v46, %v777_v47 }
 0x322   : > { %v887_v50 = vmax.f32 %v778_v49, %v886_v48 }
 0x324   : > { %v892_v51 = vsub.f32 %v555_v33, %v887_v50  ;;  %v893_v52 = vsub.f32 %v663_v36, %v887_v50  ;;  %v894_v53 = vsub.f32 %v772_v40, %v887_v50  ;;  %v895_v54 = vsub.f32 %v881_v42, %v887_v50 }
 0x326   : > { %v896_v55 = vmul.f32 1.442695, %v892_v51  ;;  %v898_v56 = vmul.f32 1.442695, %v893_v52  ;;  %v900_v57 = vmul.f32 1.442695, %v894_v53 }
 0x327   : > { %v902_v58 = vmul.f32 1.442695, %v895_v54 }
 0x328   : > { %1194 = vpow2.f32 %v896_v55 }
 0x329   : > { %1196 = vpow2.f32 %v898_v56 }
 0x32a   : > { %1198 = vpow2.f32 %v900_v57 }
 0x32b   : > { %1200 = vpow2.f32 %v902_v58 }
 0x332   : > { %v1195_v59 = vpop.eup %1194 }
 0x333   : > { %v1197_v60 = vpop.eup %1196 }
 0x334   : > { %v904_v61 = vadd.f32 %v1197_v60, %v1195_v59  ;;  %v1199_v62 = vpop.eup %1198 }
 0x335   : > { %v1201_v0 = vpop.eup %1200 }
 0x336   : > { %v905_v63 = vadd.f32 %v1199_v62, %v904_v61 }
 0x338   : > { %v906_v1 = vadd.f32 %v1201_v0, %v905_v63 }
 0x33a   : > { %907 = vadd.xlane.f32.xlu1 %v906_v1 }
 0x3c7   : > { %v908_v2 = vpop.xlane.xlu1 %907 }
 0x3c8   : > { %1202 = vrcp.f32 %v908_v2 }
 0x3d2   : > { %v1203_v3 = vpop.eup %1202 }
 0x3d3   : > { %v910_v4 = vmul.f32 %v1203_v3, %v1195_v59  ;;  %v911_v5 = vmul.f32 %v1203_v3, %v1197_v60  ;;  %v912_v6 = vmul.f32 %v1203_v3, %v1199_v62  ;;  %v913_v7 = vmul.f32 %v1203_v3, %v1201_v0 }
 0x3d5   : > { %914 = vst [vmem:[%s307_s11] sm:$0xff] %v910_v4  ;;  %915 = vst [vmem:[%s307_s11 + $0x8] sm:$0xff] %v911_v5 }
 0x3d6   : > { %916 = vst [vmem:[%s307_s11 + $0x10] sm:$0xff] %v912_v6  ;;  %917 = vst [vmem:[%s307_s11 + $0x18] sm:$0xff] %v913_v7 }
 0x3d7   : > { %1277 = shalt.err (!%p1274_p9)
}
 0x3d8   : > { %s1278_s10 = scalar_lea.hbm %s1613_s12, 512  ;;  %s1282_s16 = scalar_lea.hbm %s1667_s5, 1024 }
 0x3d9   : > { %p1279_p11 = scmp.ne.s32.totalorder %s1613_s12, %s1278_s10  ;;  %p1283_p4 = scmp.lt.u32.totalorder %s1613_s12, %s1667_s5 }
 0x3da   : > { %p1284_p8 = scmp.lt.u32.totalorder %s1282_s16, %s1278_s10  ;;  %p1286_p5 = scmp.lt.u32.totalorder %s1278_s10, %s1613_s12 }
 0x3db   : > { %p1280_p3 = pnand %p1279_p11, %p1679_p7 }
 0x3dc   : > { %p1285_p0 = por %p1284_p8, %p1283_p4 }
 0x3dd   : > { %p1281_p6 = pneg %p1280_p3 }
 0x3de   : > { %p1287_p13 = por %p1286_p5, %p1285_p0 }
 0x3e0   : > { %p1288_p10 = pnand %p1287_p13, %p1281_p6 }
 0x3e2   : > { %1291 = shalt.err (!%p1288_p10)
}
 0x3e3   : > { %1124 = dma.vmem_to_hbm [thread:$0]  (%p1679_p7), %s1615_s29, 512, %s1613_s12, %s919_s21  }
 0x3e4 PF: > { %s947_s11 = sand.u32 1, %s1330_s18   ;;  %p1680_p12 = scmp.ne.s32.totalorder %s1673_s8, 0 }
 0x3e5   : > { %p1681_p1 = scmp.ge.s32.totalorder %s1350_s23, 2  ;;  %s948_s13 = scalar_lea.sflag [#allocation4], %s947_s11 }
 0x3e7   : > { %p1134_p2 = pnand %p1681_p1, %p1680_p12 }
 0x3e9   : > { %1325 = dma.done.wait (!%p1134_p2), %s948_s13, 512  }
 0x3ea   : > { %1327 = vsyncadd (!%p1134_p2), %s948_s13, 4294966784  ;;  %s24_s23 = sadd.s32 1, %s1350_s23   ;;  %s1682_s18 = smov %s1334_s19 }
 0x3eb   : > { %p21_p9 = scmp.ge.s32.totalorder %s24_s23, 4   ;;  %s1683_s19 = smov %s1338_s20 }
 0x3ec   : > { %s1684_s20 = smov %s1446_s7  ;;  %s1685_s21 = smov %s1346_s22 }
 0x3ed   : > { %s1686_s22 = smov %s1688_s26  ;;  %23 = sbr.rel (!%p21_p9) target bundleno = 8 (0x8), region = 101 }
 0x3f4   :  { %953 = vsyncpa [#allocation3], 1 }
 0x3f5   :  { %955 = vsyncpa [#allocation3 + $0x1], 1 }
 0x3f6   :  { %956 = vsyncpa [#allocation6], 1 }
 0x3f7   :  { %958 = vsyncpa [#allocation6 + $0x1], 1 }
 0x3f8   :  { %959 = vsyncpa [#allocation4], 1 }
 0x3f9   :  { %961 = vsyncpa [#allocation4 + $0x1], 1 }

</bundles_post_ra>
